<compile_context>
chip_gen: v5e
topology: v5e:2x2
jax: 0.10.0
libtpu: 0.0.40
codegen_flags: <defaults>
</compile_context>

<pallas_src>
import jax
import jax.numpy as jnp
import numpy as np
from jax.experimental import pallas as pl
from jax.experimental.pallas import tpu as pltpu

LATENT_SIZE = 32


def _round_up(x, m):
    return ((x + m - 1) // m) * m


def node_block_kernel(node_ref, edge_ref, recv_ref, w1v_ref, w1e_ref, b1_ref,
                      w2_ref, b2_ref, out_ref, acc_ref):
    i = pl.program_id(0)           # node-tile index (parallel)
    e = pl.program_id(1)           # edge-tile index (reduction, last axis)
    n_tile = node_ref.shape[0]
    e_tile = edge_ref.shape[0]

    @pl.when(e == 0)
    def _():
        acc_ref[...] = jnp.zeros_like(acc_ref)

    # Project this edge tile to latent space first: [E_tile, 32] (lane-dense
    # MXU output instead of De-wide).
    edge_proj = jnp.dot(edge_ref[...], w1e_ref[...],
                        preferred_element_type=jnp.float32)

    # One-hot [N_tile, E_tile] for this block only; global node ids for tile i
    # compared against receiver indices.  Out-of-range / padded receivers (-1)
    # match nothing and are silently dropped (same as segment_sum).
    node_ids = (i * n_tile
                + jax.lax.broadcasted_iota(jnp.int32, (n_tile, e_tile), 0))
    onehot = (node_ids == recv_ref[...]).astype(jnp.bfloat16)

    # scatter_add contribution of this edge tile, accumulated in f32.
    acc_ref[...] += jnp.dot(onehot, edge_proj.astype(jnp.bfloat16),
                            preferred_element_type=jnp.float32)

    @pl.when(e == pl.num_programs(1) - 1)
    def _():
        # b1_ref already contains  b1 + global_attr @ W1g  (hoisted in wrapper).
        h = (acc_ref[...]
             + jnp.dot(node_ref[...], w1v_ref[...],
                       preferred_element_type=jnp.float32)
             + b1_ref[...])
        h = jnp.maximum(h, 0.0)
        out_ref[...] = (jnp.dot(h, w2_ref[...],
                                preferred_element_type=jnp.float32)
                        + b2_ref[...]).astype(out_ref.dtype)


def node_block_forward(node_attr, edge_attr, receivers, global_attr,
                       w1, b1, w2, b2, *, n_tile=None, e_tile=None):
    """node_attr [N,Dv], edge_attr [E,De], receivers [E] int32, global_attr [1,Dg].
    w1 [Dv+De+Dg, 32], b1 [32], w2 [32, out], b2 [out]."""
    N, Dv = node_attr.shape
    E, De = edge_attr.shape
    out_features = w2.shape[1]

    # Split W1 rows to match torch.cat([node, agg_received, global], dim=-1).
    w1v = w1[:Dv].astype(jnp.float32)
    w1e = w1[Dv:Dv + De].astype(jnp.float32)
    w1g = w1[Dv + De:].astype(jnp.float32)

    # Hoist the global projection: it is a [1, 32] per-call constant.
    b1_fused = (global_attr.astype(jnp.float32) @ w1g
                + b1.reshape(1, LATENT_SIZE).astype(jnp.float32))

    # Lane-dense output: pad out_features up to a multiple of 128 (zeros in the
    # padded weight/bias columns), slice after the call.
    out_pad = _round_up(max(out_features, 1), 128)
    w2_pad = jnp.zeros((LATENT_SIZE, out_pad), jnp.float32)
    w2_pad = w2_pad.at[:, :out_features].set(w2.astype(jnp.float32))
    b2_pad = jnp.zeros((1, out_pad), jnp.float32)
    b2_pad = b2_pad.at[0, :out_features].set(b2.astype(jnp.float32))

    # Tile sizes.  Defaults keep the bf16 one-hot block small (256x512 -> 256 KiB)
    # so they fit the v7x 32 MiB scoped / 64 MiB physical VMEM with double
    # buffering; v5e/v6e (128 MiB VMEM) can pass larger e_tile explicitly.
    if n_tile is None:
        n_tile = min(256, _round_up(N, 8))
    if e_tile is None:
        e_tile = min(512, _round_up(E, 128))
    n_pad = _round_up(N, n_tile)
    e_pad = _round_up(E, e_tile)

    # Pad inputs; padded edges get receiver -1 so they contribute nothing.
    node_p = jnp.zeros((n_pad, Dv), jnp.float32).at[:N].set(
        node_attr.astype(jnp.float32))
    edge_p = jnp.zeros((e_pad, De), jnp.float32).at[:E].set(
        edge_attr.astype(jnp.float32))
    recv_p = jnp.full((1, e_pad), -1, jnp.int32).at[0, :E].set(
        receivers.astype(jnp.int32))

    grid = (n_pad // n_tile, e_pad // e_tile)

    out = pl.pallas_call(
        node_block_kernel,
        out_shape=jax.ShapeDtypeStruct((n_pad, out_pad), jnp.float32),
        grid_spec=pltpu.PrefetchScalarGridSpec(
            num_scalar_prefetch=0,
            grid=grid,
            in_specs=[
                pl.BlockSpec((n_tile, Dv), lambda i, e: (i, 0)),          # nodes
                pl.BlockSpec((e_tile, De), lambda i, e: (e, 0)),          # edges
                pl.BlockSpec((1, e_tile), lambda i, e: (0, e)),           # receivers
                pl.BlockSpec((Dv, LATENT_SIZE), lambda i, e: (0, 0)),     # W1_v
                pl.BlockSpec((De, LATENT_SIZE), lambda i, e: (0, 0)),     # W1_e
                pl.BlockSpec((1, LATENT_SIZE), lambda i, e: (0, 0)),      # fused b1
                pl.BlockSpec((LATENT_SIZE, out_pad), lambda i, e: (0, 0)),  # W2
                pl.BlockSpec((1, out_pad), lambda i, e: (0, 0)),          # b2
            ],
            out_specs=pl.BlockSpec((n_tile, out_pad), lambda i, e: (i, 0)),
            scratch_shapes=[pltpu.VMEM((n_tile, LATENT_SIZE), jnp.float32)],
        ),
        compiler_params=pltpu.CompilerParams(
            dimension_semantics=("parallel", "arbitrary")),
    )(node_p, edge_p, recv_p, w1v, w1e, b1_fused, w2_pad, b2_pad)

    return out[:N, :out_features]


def reference_forward(node_attr, edge_attr, receivers, global_attr,
                      w1, b1, w2, b2):
    N = node_attr.shape[0]
    agg = jax.ops.segment_sum(edge_attr, receivers, num_segments=N)
    g = jnp.broadcast_to(global_attr, (N, global_attr.shape[1]))
    x = jnp.concatenate([node_attr, agg, g], axis=-1)
    h = jnp.maximum(x @ w1 + b1, 0.0)
    return h @ w2 + b2


if __name__ == "__main__":
    # Small synthetic graph.
    N, E = 8, 16          # nodes, edges
    Dv, De, Dg = 4, 4, 2  # node / edge / global feature dims
    out_features = 8
    in_features = Dv + De + Dg

    key = jax.random.PRNGKey(0)
    k = jax.random.split(key, 8)
    node_attr = jax.random.normal(k[0], (N, Dv), jnp.float32)
    edge_attr = jax.random.normal(k[1], (E, De), jnp.float32)
    receivers = jax.random.randint(k[2], (E,), 0, N, jnp.int32)
    global_attr = jax.random.normal(k[3], (1, Dg), jnp.float32)

    # Linear(in, 32) -> ReLU -> Linear(32, out)
    w1 = jax.random.normal(k[4], (in_features, LATENT_SIZE), jnp.float32) * 0.1
    b1 = jax.random.normal(k[5], (LATENT_SIZE,), jnp.float32) * 0.1
    w2 = jax.random.normal(k[6], (LATENT_SIZE, out_features), jnp.float32) * 0.1
    b2 = jax.random.normal(k[7], (out_features,), jnp.float32) * 0.1

    out = node_block_forward(node_attr, edge_attr, receivers, global_attr,
                             w1, b1, w2, b2)
    out = jax.block_until_ready(out)

    ref = reference_forward(node_attr, edge_attr, receivers, global_attr,
                            w1, b1, w2, b2)
    # bf16 is used for the scatter (one-hot @ edge_proj) matmul operands, so
    # allow bf16-level relative error vs the f32 reference.
    np.testing.assert_allclose(np.asarray(out), np.asarray(ref),
                               rtol=2e-2, atol=2e-2)
    print("KERNEL_OK")
</pallas_src>

<mosaic_0001>
module attributes {stable_mosaic.version = 11 : i64} {
  func.func @node_block_kernel(%arg0: i32, %arg1: i32, %arg2: memref<8x4xf32, #tpu.memory_space<vmem>>, %arg3: memref<128x4xf32, #tpu.memory_space<vmem>>, %arg4: memref<1x128xi32, #tpu.memory_space<vmem>>, %arg5: memref<4x32xf32, #tpu.memory_space<vmem>>, %arg6: memref<4x32xf32, #tpu.memory_space<vmem>>, %arg7: memref<1x32xf32, #tpu.memory_space<vmem>>, %arg8: memref<32x128xf32, #tpu.memory_space<vmem>>, %arg9: memref<1x128xf32, #tpu.memory_space<vmem>>, %arg10: memref<8x128xf32, #tpu.memory_space<vmem>>, %arg11: memref<8x32xf32, #tpu.memory_space<vmem>>) attributes {dimension_semantics = [#tpu.dimension_semantics<parallel>, #tpu.dimension_semantics<arbitrary>], iteration_bounds = array<i64: 1, 1>, scalar_prefetch = 0 : i64, scratch_operands = 1 : i64, tpu.core_type = #tpu.core_type<tc>, window_params = [{transform_indices = @transform_0, window_bounds = array<i64: 8, 4>}, {transform_indices = @transform_1, window_bounds = array<i64: 128, 4>}, {transform_indices = @transform_2, window_bounds = array<i64: 1, 128>}, {pipeline_mode = #tpu.pipeline_mode<synchronous>, transform_indices = @transform_3, window_bounds = array<i64: 4, 32>}, {pipeline_mode = #tpu.pipeline_mode<synchronous>, transform_indices = @transform_4, window_bounds = array<i64: 4, 32>}, {pipeline_mode = #tpu.pipeline_mode<synchronous>, transform_indices = @transform_5, window_bounds = array<i64: 1, 32>}, {pipeline_mode = #tpu.pipeline_mode<synchronous>, transform_indices = @transform_6, window_bounds = array<i64: 32, 128>}, {pipeline_mode = #tpu.pipeline_mode<synchronous>, transform_indices = @transform_7, window_bounds = array<i64: 1, 128>}, {transform_indices = @transform_8, window_bounds = array<i64: 8, 128>}]} {
    %c0_i32 = arith.constant 0 : i32
    %0 = arith.cmpi eq, %arg1, %c0_i32 : i32
    %1 = arith.extui %0 : i1 to i32
    %c0_i32_0 = arith.constant 0 : i32
    %2 = arith.cmpi ne, %1, %c0_i32_0 : i32
    scf.if %2 {
      %cst_13 = arith.constant 0.000000e+00 : f32
      %24 = vector.broadcast %cst_13 : f32 to vector<8x32xf32>
      %c0_14 = arith.constant 0 : index
      %c0_15 = arith.constant 0 : index
      %25 = vector.load %arg11[%c0_14, %c0_15] : memref<8x32xf32, #tpu.memory_space<vmem>>, vector<8x32xf32>
      tpu.vector_store %arg11[%c0_14, %c0_15], %24 {strides = array<i32>} : memref<8x32xf32, #tpu.memory_space<vmem>>, vector<8x32xf32>,
    } else {
    }
    %c0 = arith.constant 0 : index
    %c0_1 = arith.constant 0 : index
    %3 = vector.load %arg3[%c0, %c0_1] : memref<128x4xf32, #tpu.memory_space<vmem>>, vector<128x4xf32>
    %c0_2 = arith.constant 0 : index
    %c0_3 = arith.constant 0 : index
    %4 = vector.load %arg6[%c0_2, %c0_3] : memref<4x32xf32, #tpu.memory_space<vmem>>, vector<4x32xf32>
    %cst = arith.constant dense<0.000000e+00> : vector<128x32xf32>
    %5 = tpu.matmul %3, %4, %cst {dimension_numbers = #tpu.dot_dimension_numbers<[1], [0], [0], [1], [0, 0, 1, 1], [], []>} : vector<128x4xf32>, vector<4x32xf32>, vector<128x32xf32> -> vector<128x32xf32>
    %c8_i32 = arith.constant 8 : i32
    %6 = arith.muli %arg0, %c8_i32 : i32
    %7 = tpu.iota {dimensions = array<i32: 0>} : vector<8x128xi32>
    %8 = vector.broadcast %6 : i32 to vector<8x128xi32>
    %9 = arith.addi %8, %7 : vector<8x128xi32>
    %c0_4 = arith.constant 0 : index
    %c0_5 = arith.constant 0 : index
    %10 = vector.load %arg4[%c0_4, %c0_5] : memref<1x128xi32, #tpu.memory_space<vmem>>, vector<1x128xi32>
    %11 = vector.broadcast %10 : vector<1x128xi32> to vector<8x128xi32>
    %12 = arith.cmpi eq, %9, %11 : vector<8x128xi32>
    %13 = arith.extui %12 : vector<8x128xi1> to vector<8x128xi32>
    %14 = arith.sitofp %13 : vector<8x128xi32> to vector<8x128xf32>
    %15 = arith.truncf %14 : vector<8x128xf32> to vector<8x128xbf16>
    %c0_6 = arith.constant 0 : index
    %c0_7 = arith.constant 0 : index
    %16 = vector.load %arg11[%c0_6, %c0_7] : memref<8x32xf32, #tpu.memory_space<vmem>>, vector<8x32xf32>
    %17 = arith.truncf %5 : vector<128x32xf32> to vector<128x32xbf16>
    %cst_8 = arith.constant dense<0.000000e+00> : vector<8x32xf32>
    %18 = tpu.matmul %15, %17, %cst_8 {dimension_numbers = #tpu.dot_dimension_numbers<[1], [0], [0], [1], [0, 0, 1, 1], [], []>} : vector<8x128xbf16>, vector<128x32xbf16>, vector<8x32xf32> -> vector<8x32xf32>
    %19 = arith.addf %16, %18 : vector<8x32xf32>
    %c0_9 = arith.constant 0 : index
    %c0_10 = arith.constant 0 : index
    %20 = vector.load %arg11[%c0_9, %c0_10] : memref<8x32xf32, #tpu.memory_space<vmem>>, vector<8x32xf32>
    tpu.vector_store %arg11[%c0_9, %c0_10], %19 {strides = array<i32>} : memref<8x32xf32, #tpu.memory_space<vmem>>, vector<8x32xf32>,
    %c0_i32_11 = arith.constant 0 : i32
    %21 = arith.cmpi eq, %arg1, %c0_i32_11 : i32
    %22 = arith.extui %21 : i1 to i32
    %c0_i32_12 = arith.constant 0 : i32
    %23 = arith.cmpi ne, %22, %c0_i32_12 : i32
    scf.if %23 {
      %c0_13 = arith.constant 0 : index
      %c0_14 = arith.constant 0 : index
      %24 = vector.load %arg11[%c0_13, %c0_14] : memref<8x32xf32, #tpu.memory_space<vmem>>, vector<8x32xf32>
      %c0_15 = arith.constant 0 : index
      %c0_16 = arith.constant 0 : index
      %25 = vector.load %arg2[%c0_15, %c0_16] : memref<8x4xf32, #tpu.memory_space<vmem>>, vector<8x4xf32>
      %c0_17 = arith.constant 0 : index
      %c0_18 = arith.constant 0 : index
      %26 = vector.load %arg5[%c0_17, %c0_18] : memref<4x32xf32, #tpu.memory_space<vmem>>, vector<4x32xf32>
      %cst_19 = arith.constant dense<0.000000e+00> : vector<8x32xf32>
      %27 = tpu.matmul %25, %26, %cst_19 {dimension_numbers = #tpu.dot_dimension_numbers<[1], [0], [0], [1], [0, 0, 1, 1], [], []>} : vector<8x4xf32>, vector<4x32xf32>, vector<8x32xf32> -> vector<8x32xf32>
      %28 = arith.addf %24, %27 : vector<8x32xf32>
      %c0_20 = arith.constant 0 : index
      %c0_21 = arith.constant 0 : index
      %29 = vector.load %arg7[%c0_20, %c0_21] : memref<1x32xf32, #tpu.memory_space<vmem>>, vector<1x32xf32>
      %30 = vector.broadcast %29 : vector<1x32xf32> to vector<8x32xf32>
      %31 = arith.addf %28, %30 : vector<8x32xf32>
      %cst_22 = arith.constant 0.000000e+00 : f32
      %32 = vector.broadcast %cst_22 : f32 to vector<8x32xf32>
      %33 = arith.maximumf %31, %32 : vector<8x32xf32>
      %c0_23 = arith.constant 0 : index
      %c0_24 = arith.constant 0 : index
      %34 = vector.load %arg8[%c0_23, %c0_24] : memref<32x128xf32, #tpu.memory_space<vmem>>, vector<32x128xf32>
      %cst_25 = arith.constant dense<0.000000e+00> : vector<8x128xf32>
      %35 = tpu.matmul %33, %34, %cst_25 {dimension_numbers = #tpu.dot_dimension_numbers<[1], [0], [0], [1], [0, 0, 1, 1], [], []>} : vector<8x32xf32>, vector<32x128xf32>, vector<8x128xf32> -> vector<8x128xf32>
      %c0_26 = arith.constant 0 : index
      %c0_27 = arith.constant 0 : index
      %36 = vector.load %arg9[%c0_26, %c0_27] : memref<1x128xf32, #tpu.memory_space<vmem>>, vector<1x128xf32>
      %37 = vector.broadcast %36 : vector<1x128xf32> to vector<8x128xf32>
      %38 = arith.addf %35, %37 : vector<8x128xf32>
      %c0_28 = arith.constant 0 : index
      %c0_29 = arith.constant 0 : index
      %39 = vector.load %arg10[%c0_28, %c0_29] : memref<8x128xf32, #tpu.memory_space<vmem>>, vector<8x128xf32>
      tpu.vector_store %arg10[%c0_28, %c0_29], %38 {strides = array<i32>} : memref<8x128xf32, #tpu.memory_space<vmem>>, vector<8x128xf32>,
    } else {
    }
    return
  }
  func.func @transform_0(%arg0: i32, %arg1: i32) -> (i32, i32) {
    %c0_i32 = arith.constant 0 : i32
    %c0_i32_0 = arith.constant 0 : i32
    return %arg0, %c0_i32 : i32, i32
  }
  func.func @transform_1(%arg0: i32, %arg1: i32) -> (i32, i32) {
    %c0_i32 = arith.constant 0 : i32
    %c0_i32_0 = arith.constant 0 : i32
    return %arg1, %c0_i32 : i32, i32
  }
  func.func @transform_2(%arg0: i32, %arg1: i32) -> (i32, i32) {
    %c0_i32 = arith.constant 0 : i32
    %c0_i32_0 = arith.constant 0 : i32
    return %c0_i32, %arg1 : i32, i32
  }
  func.func @transform_3(%arg0: i32, %arg1: i32) -> (i32, i32) {
    %c0_i32 = arith.constant 0 : i32
    %c0_i32_0 = arith.constant 0 : i32
    %c0_i32_1 = arith.constant 0 : i32
    return %c0_i32, %c0_i32_0 : i32, i32
  }
  func.func @transform_4(%arg0: i32, %arg1: i32) -> (i32, i32) {
    %c0_i32 = arith.constant 0 : i32
    %c0_i32_0 = arith.constant 0 : i32
    %c0_i32_1 = arith.constant 0 : i32
    return %c0_i32, %c0_i32_0 : i32, i32
  }
  func.func @transform_5(%arg0: i32, %arg1: i32) -> (i32, i32) {
    %c0_i32 = arith.constant 0 : i32
    %c0_i32_0 = arith.constant 0 : i32
    %c0_i32_1 = arith.constant 0 : i32
    return %c0_i32, %c0_i32_0 : i32, i32
  }
  func.func @transform_6(%arg0: i32, %arg1: i32) -> (i32, i32) {
    %c0_i32 = arith.constant 0 : i32
    %c0_i32_0 = arith.constant 0 : i32
    %c0_i32_1 = arith.constant 0 : i32
    return %c0_i32, %c0_i32_0 : i32, i32
  }
  func.func @transform_7(%arg0: i32, %arg1: i32) -> (i32, i32) {
    %c0_i32 = arith.constant 0 : i32
    %c0_i32_0 = arith.constant 0 : i32
    %c0_i32_1 = arith.constant 0 : i32
    return %c0_i32, %c0_i32_0 : i32, i32
  }
  func.func @transform_8(%arg0: i32, %arg1: i32) -> (i32, i32) {
    %c0_i32 = arith.constant 0 : i32
    %c0_i32_0 = arith.constant 0 : i32
    return %arg0, %c0_i32 : i32, i32
  }
}

</mosaic_0001>

<bundles_post_ra>
// kernel: tpu_custom_call.1
= control target key start
LH: loop header
LB: loop body
LE: loop exit
PB: predicated region body
PF: predicated region fallthrough
CT: control target
= control target key end

     0   :  { %vm102_vm0 = vcmask 1043456   ;;  %vm53_vm1 = vcmask 31744   ;;  %s504_s0 = inlined_call_operand.vmem [shape: f32[8,4], index: 0, kind: input, shape index: {}]   ;;  %s505_s1 = inlined_call_operand.vmem [shape: f32[128,4], index: 1, kind: input, shape index: {}]   ;;  %s506_s2 = inlined_call_operand.vmem [shape: s32[1,128], index: 2, kind: input, shape index: {}]   ;;  %s507_s3 = inlined_call_operand.vmem [shape: f32[4,32], index: 3, kind: input, shape index: {}]   ;;  %s508_s4 = inlined_call_operand.vmem [shape: f32[4,32], index: 4, kind: input, shape index: {}]   ;;  %s509_s5 = inlined_call_operand.vmem [shape: f32[1,32], index: 5, kind: input, shape index: {}]   ;;  %s510_s6 = inlined_call_operand.vmem [shape: f32[32,128], index: 6, kind: input, shape index: {}]   ;;  %s511_s7 = inlined_call_operand.vmem [shape: f32[1,128], index: 7, kind: input, shape index: {}]   ;;  %s512_s8 = inlined_call_operand.hbm [shape: f32[8,128], index: 8, kind: output, shape index: {}]  }
   0x1   :  { %v52_v0 = vld [vmem:[%s508_s4] sm:$0xf]  ;;  %v42_v1 = vld [vmem:[%s505_s1 + $0x30] sm:$0xff]  ;;  %v47_v2 = vld [vmem:[%s505_s1 + $0x58] sm:$0xff] }
   0x2   :  { %317 = vmatpush.msk.msra.mxu2 %vm102_vm0, %v52_v0  ;;  %318 = vmatpush.msk.msra.mxu3 %vm102_vm0, %v52_v0  ;;  %v36_v3 = vld [vmem:[%s505_s1] sm:$0xff] }
   0x3   :  { %301 = vmatmul.msk.f32.vlgmr.msra.gmra.mxu2 %vm53_vm1, %v42_v1  ;;  %306 = vmatmul.msk.f32.vlgmr.msra.gmra.mxu3 %vm53_vm1, %v47_v2 }
   0x4   :  { %294 = vmatpush.msk.msra.mxu0 %vm102_vm0, %v52_v0 }
   0x5   :  { %295 = vmatmul.msk.f32.vlgmr.msra.gmra.mxu0 %vm53_vm1, %v36_v3 }
   0x6   :  { %13 = vsyncpa [#allocation4], 0  ;;  %v43_v4 = vld [vmem:[%s505_s1 + $0x38] sm:$0xff]  ;;  %v48_v5 = vld [vmem:[%s505_s1 + $0x60] sm:$0xff]  ;;  %vm34_vm2 = vcmask 261120   ;;  %v351_v35 = vmov 0.0   ;;  %v172_v44 = vlaneseq }
   0x7   :  { %v37_v6 = vld [vmem:[%s505_s1 + $0x8] sm:$0xff]  ;;  %v44_v7 = vld [vmem:[%s505_s1 + $0x40] sm:$0xff]  ;;  %v38_v9 = vld [vmem:[%s505_s1 + $0x10] sm:$0xff]  ;;  %35 = vst.msk [vmem:[#allocation2] sm:$0xff] %vm34_vm2, %v351_v35  ;;  %v352_v50 = vmov 1.0|1.0  }
   0x8   :  { %v49_v8 = vld [vmem:[%s505_s1 + $0x68] sm:$0xff]  ;;  %v50_v11 = vld [vmem:[%s505_s1 + $0x70] sm:$0xff]  ;;  %v39_v12 = vld [vmem:[%s505_s1 + $0x18] sm:$0xff]  ;;  %v173_v46 = vshrl.u32 %v172_v44, 7  ;;  %s353_s28 = smov [#allocation3]   ;;  %s285_s10 = sshll.u32 %s512_s8, 4  ;;  %s286_s10 = int_to_ptr.hbm [resolvable:$true] %s285_s10 }
   0x9   :  { %v45_v10 = vld [vmem:[%s505_s1 + $0x48] sm:$0xff]  ;;  %v46_v13 = vld [vmem:[%s505_s1 + $0x50] sm:$0xff]  ;;  %v51_v14 = vld [vmem:[%s505_s1 + $0x78] sm:$0xff]  ;;  %s283_s29 = sshll.u32 %s353_s28, 4  ;;  %s284_s29 = int_to_ptr.vmem [resolvable:$true] %s283_s29 }
   0xa   :  { %v40_v15 = vld [vmem:[%s505_s1 + $0x20] sm:$0xff]  ;;  %v41_v16 = vld [vmem:[%s505_s1 + $0x28] sm:$0xff]  ;;  %v249_v33 = vld [vmem:[%s510_s6 + $0x18] sm:$0xff] }
   0xb   :  { %302 = vmatmul.msk.f32.gmra.mxu2 %vm53_vm1, %v43_v4  ;;  %307 = vmatmul.msk.f32.gmra.mxu3 %vm53_vm1, %v48_v5  ;;  %v212_v17 = vld [vmem:[%s507_s3] sm:$0xf]  ;;  %v248_v34 = vld [vmem:[%s510_s6 + $0x10] sm:$0xff]  ;;  %v247_v37 = vld [vmem:[%s510_s6 + $0x8] sm:$0xff] }
   0xc   :  { %314 = vmatpush.msk.msrb.mxu2 %vm102_vm0, %v212_v17  ;;  %v211_v32 = vld [vmem:[%s504_s0] sm:$0xff]  ;;  %269 = vmatpush.msrb.mxu3 %v249_v33 }
   0xd   :  { %296 = vmatmul.msk.f32.gmra.mxu0 %vm53_vm1, %v37_v6  ;;  %v322_v47 = vld [vmem:[%s506_s2] ss:$0 sm:$0xff] }
   0xe   :  { %270 = vmatpush.msrb.mxu3 %v248_v34  ;;  %vm178_vm3 = vcmp.eq.s32.totalorder %v173_v46, %v322_v47  ;;  %v246_v51 = vld [vmem:[%s510_s6] sm:$0xff] }
   0xf   :  { %vm312_vm4 = vmpackc.low %vm178_vm3, %vm178_vm3  ;;  %v182_v52 = vld [vmem:[#allocation2] sm:$0xff] }
  0x10   :  { %271 = vmatpush.msrb.mxu3 %v247_v37  ;;  %v323_v57 = vld [vmem:[%s509_s5] ss:$0 sm:$0xff] }
  0x11   :  { %v324_v62 = vld [vmem:[%s511_s7] ss:$0 sm:$0xff] }
  0x12   :  { %272 = vmatpush.msrb.mxu3 %v246_v51 }
  0x13   :  { %303 = vmatmul.msk.f32.gmra.mxu2 %vm53_vm1, %v44_v7  ;;  %308 = vmatmul.msk.f32.gmra.mxu3 %vm53_vm1, %v49_v8 }
  0x15   :  { %297 = vmatmul.msk.f32.gmra.mxu0 %vm53_vm1, %v38_v9 }
  0x1b   :  { %304 = vmatmul.msk.f32.gmra.mxu2 %vm53_vm1, %v45_v10  ;;  %309 = vmatmul.msk.f32.gmra.mxu3 %vm53_vm1, %v50_v11 }
  0x1d   :  { %298 = vmatmul.msk.f32.gmra.mxu0 %vm53_vm1, %v39_v12 }
  0x23   :  { %305 = vmatmul.msk.f32.gmra.mxu2 %vm53_vm1, %v46_v13  ;;  %310 = vmatmul.msk.f32.gmra.mxu3 %vm53_vm1, %v51_v14 }
  0x25   :  { %299 = vmatmul.msk.f32.gmra.mxu0 %vm53_vm1, %v40_v15 }
  0x2b   :  { %315 = vmatmul.msk.f32.vlgmr.msrb.gmra.mxu2 %vm53_vm1, %v211_v32 }
  0x2d   :  { %300 = vmatmul.msk.f32.gmra.mxu0 %vm53_vm1, %v41_v16 }
  0x82   :  { %v123_v18 = vpop.f32.mrf.mxu0 }
  0x86   :  { %v141_v19 = vpop.f32.mrf.mxu2  ;;  %v156_v20 = vpop.f32.mrf.mxu3 }
  0x8a   :  { %v126_v23 = vpop.f32.mrf.mxu0 }
  0x8b   :  { %v183_v49 = vpack.c.bf16 %v126_v23, %v123_v18 }
  0x8e   :  { %v144_v21 = vpop.f32.mrf.mxu2  ;;  %v159_v22 = vpop.f32.mrf.mxu3 }
  0x8f   :  { %v186_v42 = vpack.c.bf16 %v144_v21, %v141_v19 }
  0x92   :  { %v129_v26 = vpop.f32.mrf.mxu0 }
  0x96   :  { %v162_v24 = vpop.f32.mrf.mxu3  ;;  %v147_v25 = vpop.f32.mrf.mxu2 }
  0x97   :  { %v189_v36 = vpack.c.bf16 %v162_v24, %v159_v22 }
  0x9a   :  { %v132_v29 = vpop.f32.mrf.mxu0 }
  0x9b   :  { %v184_v48 = vpack.c.bf16 %v132_v29, %v129_v26 }
  0x9e   :  { %v165_v27 = vpop.f32.mrf.mxu3  ;;  %v150_v28 = vpop.f32.mrf.mxu2 }
  0x9f   :  { %v187_v41 = vpack.c.bf16 %v150_v28, %v147_v25 }
  0xa2   :  { %v135_v39 = vpop.f32.mrf.mxu0 }
  0xa6   :  { %v168_v30 = vpop.f32.mrf.mxu3  ;;  %v153_v38 = vpop.f32.mrf.mxu2 }
  0xa7   :  { %v190_v31 = vpack.c.bf16 %v168_v30, %v165_v27  ;;  %v188_v40 = vpack.c.bf16 %v156_v20, %v153_v38 }
  0xa9   :  { %191 = vmatpush.bf16.msra.mxu1 %v190_v31 }
  0xaa   :  { %v138_v43 = vpop.f32.mrf.mxu0 }
  0xab   :  { %v185_v45 = vpack.c.bf16 %v138_v43, %v135_v39 }
  0xad   :  { %192 = vmatpush.bf16.msra.mxu1 %v189_v36 }
  0xae   :  { %v236_v56 = vpop.f32.mrf.mxu2 }
  0xb1   :  { %193 = vmatpush.bf16.msra.mxu1 %v188_v40 }
  0xb5   :  { %194 = vmatpush.bf16.msra.mxu1 %v187_v41 }
  0xb9   :  { %195 = vmatpush.bf16.msra.mxu1 %v186_v42 }
  0xbd   :  { %196 = vmatpush.bf16.msra.mxu1 %v185_v45 }
  0xc1   :  { %197 = vmatpush.bf16.msra.mxu1 %v184_v48 }
  0xc5   :  { %198 = vmatpush.bf16.msra.mxu1 %v183_v49 }
  0xc8   :  { %313 = vmatmul.msk.bf16.vlgmr.msra.gmra.mxu1 %vm312_vm4, %v352_v50 }
 0x145   :  { %v200_v53 = vpop.f32.mrf.mxu1 }
 0x146   :  { %v204_v54 = vadd.f32 %v200_v53, %v182_v52 }
 0x148   :  { %206 = vst.msk [vmem:[#allocation2] sm:$0xff] %vm34_vm2, %v204_v54 }
 0x14d   :  { %v202_v55 = vpop.f32.mrf.mxu1 }
 0x14f   :  { %v210_v58 = vld [vmem:[#allocation2] sm:$0xff] }
 0x150   :  { %v239_v59 = vadd.f32 %v236_v56, %v210_v58 }
 0x152   :  { %v244_v60 = vadd.f32 %v323_v57, %v239_v59 }
 0x154   :  { %v245_v61 = vmax.f32 %v244_v60, 0.0 }
 0x156   :  { %316 = vmatmul.msk.f32.vlgmr.msrb.gmra.mxu3 %vm34_vm2, %v245_v61 }
 0x1d9   :  { %v274_v63 = vpop.f32.mrf.mxu3 }
 0x1da   :  { %v275_v0 = vadd.f32 %v324_v62, %v274_v63 }
 0x1dc   :  { %277 = vst [vmem:[#allocation3] sm:$0xff] %v275_v0 }
 0x1dd   :  { %288 = dma.vmem_to_hbm [thread:$0]  %s284_s29, 128, %s286_s10, [#allocation4]  }
 0x1de   :  { %349 = dma.done.wait [#allocation4], 128  }
 0x1df   :  { %350 = vsyncadd [#allocation4], 4294967168 }
 0x1e0   :  { %293 = vsyncpa [#allocation4], 1 }

</bundles_post_ra>
